<compile_context>
chip_gen: v5e
topology: v5e:2x2
jax: 0.10.0
libtpu: 0.0.40
codegen_flags: <defaults>
</compile_context>

<pallas_src>
import functools

import jax
import jax.numpy as jnp
from jax.experimental import pallas as pl
from jax.experimental.pallas import tpu as pltpu


def _rnn_kernel(S, B, activation, x_ref, h0_ref, wxh_ref, whh_ref, b_ref, hseq_ref):
    """Whole RNN forward in one kernel invocation (all operands resident in VMEM).

    x_ref   : (S*B, I)  bf16   input, pre-flattened over (seq, batch) in the wrapper
    h0_ref  : (B, H)    f32    initial hidden state
    wxh_ref : (I, H)    bf16   = W_xh.weight.T
    whh_ref : (H, H)    bf16   = W_hh.weight.T
    b_ref   : (1, H)    f32    = b_xh + b_hh (fused once)
    hseq_ref: (S*B, H)  f32    hidden states for every step (lane-dense, H = 128)
    """
    whh = whh_ref[...]

    # Hoisted input projection + fused bias: ONE MXU matmul, off the serial chain.
    xproj = (jnp.dot(x_ref[...], wxh_ref[...], preferred_element_type=jnp.float32)
             + b_ref[...])                                            # (S*B, H) f32

    if activation == "tanh":
        act = jnp.tanh
    else:  # 'relu'
        act = lambda z: jnp.maximum(z, 0.0)

    h = h0_ref[...]                                                   # (B, H) f32
    # S is small & static -> fully unrolled recurrence; static slices of xproj and
    # static-slice stores to hseq_ref (no per-step dynamic slicing of x).
    for t in range(S):
        z = xproj[t * B:(t + 1) * B, :] + jnp.dot(
            h.astype(jnp.bfloat16), whh, preferred_element_type=jnp.float32)
        h = act(z)                                                    # f32 nonlinearity
        hseq_ref[t * B:(t + 1) * B, :] = h


def prepare_rnn_params(w_xh, b_xh, w_hh, b_hh):
    """One-time weight prep (transpose + bf16 cast + bias fusion), outside the hot path.

    w_xh: (H, I), b_xh: (H,), w_hh: (H, H), b_hh: (H,)  -- PyTorch Linear layout.
    """
    wxh_t = jnp.asarray(w_xh, jnp.float32).T.astype(jnp.bfloat16)     # (I, H)
    whh_t = jnp.asarray(w_hh, jnp.float32).T.astype(jnp.bfloat16)     # (H, H)
    b = (jnp.asarray(b_xh, jnp.float32)
         + jnp.asarray(b_hh, jnp.float32)).reshape(1, -1)             # (1, H)
    return wxh_t, whh_t, b


@functools.partial(jax.jit, static_argnames=("activation",))
def rnn_forward(x, wxh_t, whh_t, b_fused, h=None, activation="tanh"):
    """x: (S, B, I) float. Returns (h_seq (S,B,H), h (1,B,H)) like the PyTorch module."""
    S, B, I = x.shape
    H = whh_t.shape[0]
    if h is None:
        h0 = jnp.zeros((B, H), jnp.float32)
    else:
        h0 = jnp.asarray(h, jnp.float32).reshape(B, H)

    x2d = x.reshape(S * B, I).astype(jnp.bfloat16)                    # flatten outside kernel

    kernel = functools.partial(_rnn_kernel, S, B, activation)
    vmem = pl.BlockSpec(memory_space=pltpu.MemorySpace.VMEM)

    hseq_flat = pl.pallas_call(
        kernel,
        out_shape=jax.ShapeDtypeStruct((S * B, H), jnp.float32),
        in_specs=[vmem] * 5,
        out_specs=vmem,
    )(x2d, h0, wxh_t, whh_t, b_fused)

    h_seq = hseq_flat.reshape(S, B, H)
    return h_seq, h_seq[-1:]                                          # (S,B,H), (1,B,H)


def _init_linear(key, out_features, in_features):
    """Deterministic PyTorch-style init: U(-1/sqrt(fan_in), 1/sqrt(fan_in))."""
    kw, kb = jax.random.split(key)
    bound = 1.0 / jnp.sqrt(jnp.float32(in_features))
    w = jax.random.uniform(kw, (out_features, in_features), jnp.float32, -bound, bound)
    b = jax.random.uniform(kb, (out_features,), jnp.float32, -bound, bound)
    return w, b


def reference_forward(x, w_xh, b_xh, w_hh, b_hh, activation="tanh", h0=None):
    """Pure-JAX f32 reference mirroring the PyTorch module."""
    S, B, I = x.shape
    H = w_hh.shape[0]
    h = jnp.zeros((B, H), jnp.float32) if h0 is None else jnp.asarray(h0).reshape(B, H)
    act = jnp.tanh if activation == "tanh" else jax.nn.relu
    hs = []
    for t in range(S):
        h = act(x[t] @ w_xh.T + b_xh + h @ w_hh.T + b_hh)
        hs.append(h)
    return jnp.stack(hs, 0), hs[-1][None]


if __name__ == "__main__":
    # Small shapes consistent with the module (MNIST-row style sequence):
    seq_len, batch, input_size, hidden_size = 8, 2, 28, 128

    key = jax.random.PRNGKey(0)
    kx, k1, k2 = jax.random.split(key, 3)

    x = jax.random.normal(kx, (seq_len, batch, input_size), jnp.float32)
    w_hh, b_hh = _init_linear(k1, hidden_size, hidden_size)   # RNN.W_hh
    w_xh, b_xh = _init_linear(k2, hidden_size, input_size)    # RNN.W_xh

    wxh_t, whh_t, b_fused = prepare_rnn_params(w_xh, b_xh, w_hh, b_hh)

    h_seq, h_last = rnn_forward(x, wxh_t, whh_t, b_fused)
    h_seq = jax.block_until_ready(h_seq)
    h_last = jax.block_until_ready(h_last)

    ref_seq, ref_last = reference_forward(x, w_xh, b_xh, w_hh, b_hh)
    assert h_seq.shape == (seq_len, batch, hidden_size)
    assert h_last.shape == (1, batch, hidden_size)
    # bf16 matmul operands w/ f32 accumulation -> small numeric deltas vs the f32 reference.
    assert jnp.allclose(h_seq, ref_seq, atol=2e-2, rtol=2e-2), "h_seq mismatch vs reference"
    assert jnp.allclose(h_last, ref_last, atol=2e-2, rtol=2e-2), "h mismatch vs reference"

    print("KERNEL_OK")
</pallas_src>

<mosaic_0001>
module attributes {stable_mosaic.version = 11 : i64} {
  func.func @_rnn_kernel(%arg0: memref<16x28xbf16, #tpu.memory_space<vmem>>, %arg1: memref<2x128xf32, #tpu.memory_space<vmem>>, %arg2: memref<28x128xbf16, #tpu.memory_space<vmem>>, %arg3: memref<128x128xbf16, #tpu.memory_space<vmem>>, %arg4: memref<1x128xf32, #tpu.memory_space<vmem>>, %arg5: memref<16x128xf32, #tpu.memory_space<vmem>>) attributes {dimension_semantics = [], scalar_prefetch = 0 : i64, scratch_operands = 0 : i64, tpu.core_type = #tpu.core_type<tc>} {
    %c0 = arith.constant 0 : index
    %c0_0 = arith.constant 0 : index
    %0 = vector.load %arg3[%c0, %c0_0] : memref<128x128xbf16, #tpu.memory_space<vmem>>, vector<128x128xbf16>
    %c0_1 = arith.constant 0 : index
    %c0_2 = arith.constant 0 : index
    %1 = vector.load %arg0[%c0_1, %c0_2] : memref<16x28xbf16, #tpu.memory_space<vmem>>, vector<16x28xbf16>
    %c0_3 = arith.constant 0 : index
    %c0_4 = arith.constant 0 : index
    %2 = vector.load %arg2[%c0_3, %c0_4] : memref<28x128xbf16, #tpu.memory_space<vmem>>, vector<28x128xbf16>
    %cst = arith.constant dense<0.000000e+00> : vector<16x128xf32>
    %3 = tpu.matmul %1, %2, %cst {dimension_numbers = #tpu.dot_dimension_numbers<[1], [0], [0], [1], [0, 0, 1, 1], [], []>} : vector<16x28xbf16>, vector<28x128xbf16>, vector<16x128xf32> -> vector<16x128xf32>
    %c0_5 = arith.constant 0 : index
    %c0_6 = arith.constant 0 : index
    %4 = vector.load %arg4[%c0_5, %c0_6] : memref<1x128xf32, #tpu.memory_space<vmem>>, vector<1x128xf32>
    %5 = vector.broadcast %4 : vector<1x128xf32> to vector<16x128xf32>
    %6 = arith.addf %3, %5 : vector<16x128xf32>
    %c0_7 = arith.constant 0 : index
    %c0_8 = arith.constant 0 : index
    %7 = vector.load %arg1[%c0_7, %c0_8] : memref<2x128xf32, #tpu.memory_space<vmem>>, vector<2x128xf32>
    %8 = vector.extract_strided_slice %6 {offsets = [0, 0], sizes = [2, 128], strides = [1, 1]} : vector<16x128xf32> to vector<2x128xf32>
    %9 = arith.truncf %7 : vector<2x128xf32> to vector<2x128xbf16>
    %cst_9 = arith.constant dense<0.000000e+00> : vector<2x128xf32>
    %10 = tpu.matmul %9, %0, %cst_9 {dimension_numbers = #tpu.dot_dimension_numbers<[1], [0], [0], [1], [0, 0, 1, 1], [], []>} : vector<2x128xbf16>, vector<128x128xbf16>, vector<2x128xf32> -> vector<2x128xf32>
    %11 = arith.addf %8, %10 : vector<2x128xf32>
    %12 = math.tanh %11 : vector<2x128xf32>
    %c0_10 = arith.constant 0 : index
    %c0_11 = arith.constant 0 : index
    %13 = vector.load %arg5[%c0_10, %c0_11] : memref<16x128xf32, #tpu.memory_space<vmem>>, vector<2x128xf32>
    tpu.vector_store %arg5[%c0_10, %c0_11], %12 {strides = array<i32>} : memref<16x128xf32, #tpu.memory_space<vmem>>, vector<2x128xf32>,
    %14 = vector.extract_strided_slice %6 {offsets = [2, 0], sizes = [2, 128], strides = [1, 1]} : vector<16x128xf32> to vector<2x128xf32>
    %15 = arith.truncf %12 : vector<2x128xf32> to vector<2x128xbf16>
    %cst_12 = arith.constant dense<0.000000e+00> : vector<2x128xf32>
    %16 = tpu.matmul %15, %0, %cst_12 {dimension_numbers = #tpu.dot_dimension_numbers<[1], [0], [0], [1], [0, 0, 1, 1], [], []>} : vector<2x128xbf16>, vector<128x128xbf16>, vector<2x128xf32> -> vector<2x128xf32>
    %17 = arith.addf %14, %16 : vector<2x128xf32>
    %18 = math.tanh %17 : vector<2x128xf32>
    %c2 = arith.constant 2 : index
    %c0_13 = arith.constant 0 : index
    %19 = vector.load %arg5[%c2, %c0_13] : memref<16x128xf32, #tpu.memory_space<vmem>>, vector<2x128xf32>
    tpu.vector_store %arg5[%c2, %c0_13], %18 {strides = array<i32>} : memref<16x128xf32, #tpu.memory_space<vmem>>, vector<2x128xf32>,
    %20 = vector.extract_strided_slice %6 {offsets = [4, 0], sizes = [2, 128], strides = [1, 1]} : vector<16x128xf32> to vector<2x128xf32>
    %21 = arith.truncf %18 : vector<2x128xf32> to vector<2x128xbf16>
    %cst_14 = arith.constant dense<0.000000e+00> : vector<2x128xf32>
    %22 = tpu.matmul %21, %0, %cst_14 {dimension_numbers = #tpu.dot_dimension_numbers<[1], [0], [0], [1], [0, 0, 1, 1], [], []>} : vector<2x128xbf16>, vector<128x128xbf16>, vector<2x128xf32> -> vector<2x128xf32>
    %23 = arith.addf %20, %22 : vector<2x128xf32>
    %24 = math.tanh %23 : vector<2x128xf32>
    %c4 = arith.constant 4 : index
    %c0_15 = arith.constant 0 : index
    %25 = vector.load %arg5[%c4, %c0_15] : memref<16x128xf32, #tpu.memory_space<vmem>>, vector<2x128xf32>
    tpu.vector_store %arg5[%c4, %c0_15], %24 {strides = array<i32>} : memref<16x128xf32, #tpu.memory_space<vmem>>, vector<2x128xf32>,
    %26 = vector.extract_strided_slice %6 {offsets = [6, 0], sizes = [2, 128], strides = [1, 1]} : vector<16x128xf32> to vector<2x128xf32>
    %27 = arith.truncf %24 : vector<2x128xf32> to vector<2x128xbf16>
    %cst_16 = arith.constant dense<0.000000e+00> : vector<2x128xf32>
    %28 = tpu.matmul %27, %0, %cst_16 {dimension_numbers = #tpu.dot_dimension_numbers<[1], [0], [0], [1], [0, 0, 1, 1], [], []>} : vector<2x128xbf16>, vector<128x128xbf16>, vector<2x128xf32> -> vector<2x128xf32>
    %29 = arith.addf %26, %28 : vector<2x128xf32>
    %30 = math.tanh %29 : vector<2x128xf32>
    %c6 = arith.constant 6 : index
    %c0_17 = arith.constant 0 : index
    %31 = vector.load %arg5[%c6, %c0_17] : memref<16x128xf32, #tpu.memory_space<vmem>>, vector<2x128xf32>
    tpu.vector_store %arg5[%c6, %c0_17], %30 {strides = array<i32>} : memref<16x128xf32, #tpu.memory_space<vmem>>, vector<2x128xf32>,
    %32 = vector.extract_strided_slice %6 {offsets = [8, 0], sizes = [2, 128], strides = [1, 1]} : vector<16x128xf32> to vector<2x128xf32>
    %33 = arith.truncf %30 : vector<2x128xf32> to vector<2x128xbf16>
    %cst_18 = arith.constant dense<0.000000e+00> : vector<2x128xf32>
    %34 = tpu.matmul %33, %0, %cst_18 {dimension_numbers = #tpu.dot_dimension_numbers<[1], [0], [0], [1], [0, 0, 1, 1], [], []>} : vector<2x128xbf16>, vector<128x128xbf16>, vector<2x128xf32> -> vector<2x128xf32>
    %35 = arith.addf %32, %34 : vector<2x128xf32>
    %36 = math.tanh %35 : vector<2x128xf32>
    %c8 = arith.constant 8 : index
    %c0_19 = arith.constant 0 : index
    %37 = vector.load %arg5[%c8, %c0_19] : memref<16x128xf32, #tpu.memory_space<vmem>>, vector<2x128xf32>
    tpu.vector_store %arg5[%c8, %c0_19], %36 {strides = array<i32>} : memref<16x128xf32, #tpu.memory_space<vmem>>, vector<2x128xf32>,
    %38 = vector.extract_strided_slice %6 {offsets = [10, 0], sizes = [2, 128], strides = [1, 1]} : vector<16x128xf32> to vector<2x128xf32>
    %39 = arith.truncf %36 : vector<2x128xf32> to vector<2x128xbf16>
    %cst_20 = arith.constant dense<0.000000e+00> : vector<2x128xf32>
    %40 = tpu.matmul %39, %0, %cst_20 {dimension_numbers = #tpu.dot_dimension_numbers<[1], [0], [0], [1], [0, 0, 1, 1], [], []>} : vector<2x128xbf16>, vector<128x128xbf16>, vector<2x128xf32> -> vector<2x128xf32>
    %41 = arith.addf %38, %40 : vector<2x128xf32>
    %42 = math.tanh %41 : vector<2x128xf32>
    %c10 = arith.constant 10 : index
    %c0_21 = arith.constant 0 : index
    %43 = vector.load %arg5[%c10, %c0_21] : memref<16x128xf32, #tpu.memory_space<vmem>>, vector<2x128xf32>
    tpu.vector_store %arg5[%c10, %c0_21], %42 {strides = array<i32>} : memref<16x128xf32, #tpu.memory_space<vmem>>, vector<2x128xf32>,
    %44 = vector.extract_strided_slice %6 {offsets = [12, 0], sizes = [2, 128], strides = [1, 1]} : vector<16x128xf32> to vector<2x128xf32>
    %45 = arith.truncf %42 : vector<2x128xf32> to vector<2x128xbf16>
    %cst_22 = arith.constant dense<0.000000e+00> : vector<2x128xf32>
    %46 = tpu.matmul %45, %0, %cst_22 {dimension_numbers = #tpu.dot_dimension_numbers<[1], [0], [0], [1], [0, 0, 1, 1], [], []>} : vector<2x128xbf16>, vector<128x128xbf16>, vector<2x128xf32> -> vector<2x128xf32>
    %47 = arith.addf %44, %46 : vector<2x128xf32>
    %48 = math.tanh %47 : vector<2x128xf32>
    %c12 = arith.constant 12 : index
    %c0_23 = arith.constant 0 : index
    %49 = vector.load %arg5[%c12, %c0_23] : memref<16x128xf32, #tpu.memory_space<vmem>>, vector<2x128xf32>
    tpu.vector_store %arg5[%c12, %c0_23], %48 {strides = array<i32>} : memref<16x128xf32, #tpu.memory_space<vmem>>, vector<2x128xf32>,
    %50 = vector.extract_strided_slice %6 {offsets = [14, 0], sizes = [2, 128], strides = [1, 1]} : vector<16x128xf32> to vector<2x128xf32>
    %51 = arith.truncf %48 : vector<2x128xf32> to vector<2x128xbf16>
    %cst_24 = arith.constant dense<0.000000e+00> : vector<2x128xf32>
    %52 = tpu.matmul %51, %0, %cst_24 {dimension_numbers = #tpu.dot_dimension_numbers<[1], [0], [0], [1], [0, 0, 1, 1], [], []>} : vector<2x128xbf16>, vector<128x128xbf16>, vector<2x128xf32> -> vector<2x128xf32>
    %53 = arith.addf %50, %52 : vector<2x128xf32>
    %54 = math.tanh %53 : vector<2x128xf32>
    %c14 = arith.constant 14 : index
    %c0_25 = arith.constant 0 : index
    %55 = vector.load %arg5[%c14, %c0_25] : memref<16x128xf32, #tpu.memory_space<vmem>>, vector<2x128xf32>
    tpu.vector_store %arg5[%c14, %c0_25], %54 {strides = array<i32>} : memref<16x128xf32, #tpu.memory_space<vmem>>, vector<2x128xf32>,
    return
  }
}

</mosaic_0001>

<bundles_post_ra>
// kernel: rnn_forward.1
= control target key start
LH: loop header
LB: loop body
LE: loop exit
PB: predicated region body
PF: predicated region fallthrough
CT: control target
= control target key end

     0   :  { %10 = vsyncpa [#allocation3], 0  ;;  %s426_s21 = smov [#allocation2]   ;;  %s427_s23 = smov 64   ;;  %s504_s0 = inlined_call_operand.vmem [shape: bf16[16,28], index: 0, kind: input, shape index: {}]   ;;  %s505_s1 = inlined_call_operand.vmem [shape: f32[2,128], index: 1, kind: input, shape index: {}]   ;;  %s506_s2 = inlined_call_operand.vmem [shape: bf16[28,128], index: 2, kind: input, shape index: {}]   ;;  %s507_s3 = inlined_call_operand.hbm [shape: bf16[128,128], index: 3, kind: input, shape index: {}]   ;;  %s508_s4 = inlined_call_operand.vmem [shape: f32[1,128], index: 4, kind: input, shape index: {}]   ;;  %s509_s5 = inlined_call_operand.vmem [shape: f32[16,128], index: 5, kind: output, shape index: {}]  }
   0x1   :  { %s21_s20 = sshll.u32 %s507_s3, 4  ;;  %s23_s22 = sshll.u32 %s426_s21, 4  ;;  %s22_s20 = int_to_ptr.hbm [resolvable:$true] %s21_s20  ;;  %s24_s22 = int_to_ptr.vmem [resolvable:$true] %s23_s22 }
   0x2   :  { %s428_s24 = smov 4  }
   0x3   :  { %29 = dma.hbm_to_vmem [thread:$0]  %s22_s20, 1024, %s24_s22, [#allocation3], %s427_s23, %s427_s23, %s428_s24  }
   0x4   :  { %424 = dma.done.wait [#allocation3], 1024  }
   0x5   :  { %425 = vsyncadd [#allocation3], 4294966272  ;;  %v376_v0 = vld [vmem:[#allocation2 + $0x38] sm:$0xff]  ;;  %v334_v1 = vld [vmem:[%s506_s2 + $0x8] sm:$0xf]  ;;  %vm83_vm0 = vcmask 1045504  }
   0x6   :  { %v379_v2 = vld [vmem:[%s506_s2 + $0x8] sm:$0x30]  ;;  %151 = vmatpush.bf16.msra.mxu1 %v376_v0  ;;  %v375_v3 = vld [vmem:[#allocation2 + $0x30] sm:$0xff]  ;;  %168 = vmatpush.bf16.msra.mxu2 %v376_v0  ;;  %v378_v6 = vld [vmem:[%s506_s2] sm:$0xff]  ;;  %vm79_vm1 = vcmask 228352  }
   0x7   :  { %v335_v4 = vor.u32 %v379_v2, %v334_v1  ;;  %191 = vmatpush.bf16.msra.mxu3 %v376_v0  ;;  %v374_v7 = vld [vmem:[#allocation2 + $0x28] sm:$0xff]  ;;  %v377_v8 = vld [vmem:[%s504_s0] sm:$0xff]  ;;  %v372_v10 = vld [vmem:[#allocation2 + $0x18] sm:$0xff] }
   0x8   :  { %v373_v9 = vld [vmem:[#allocation2 + $0x20] sm:$0xff]  ;;  %v371_v11 = vld [vmem:[#allocation2 + $0x10] sm:$0xff]  ;;  %v370_v12 = vld [vmem:[#allocation2 + $0x8] sm:$0xff] }
   0x9   :  { %v85_v5 = vsel %vm83_vm0, %v335_v4, 0  ;;  %v369_v13 = vld [vmem:[#allocation2] sm:$0xff] }
   0xa   :  { %93 = vmatpush.bf16.msra.mxu0 %v85_v5  ;;  %152 = vmatpush.bf16.msra.mxu1 %v375_v3  ;;  %v101_v14 = vld [vmem:[%s505_s1] sm:$0x3] }
   0xb   :  { %169 = vmatpush.bf16.msra.mxu2 %v375_v3  ;;  %192 = vmatpush.bf16.msra.mxu3 %v375_v3  ;;  %v102_v15 = vpack.c.bf16 %v101_v14, %v101_v14  ;;  %v383_v16 = vld [vmem:[%s508_s4] ss:$0 sm:$0xff] }
   0xe   :  { %94 = vmatpush.bf16.msra.mxu0 %v378_v6  ;;  %153 = vmatpush.bf16.msra.mxu1 %v374_v7 }
   0xf   :  { %170 = vmatpush.bf16.msra.mxu2 %v374_v7  ;;  %193 = vmatpush.bf16.msra.mxu3 %v374_v7 }
  0x11   :  { %336 = vmatmul.msk.bf16.vlgmr.msra.gmra.mxu0 %vm79_vm1, %v377_v8 }
  0x12   :  { %214 = vmatpush.bf16.msrb.mxu0 %v376_v0  ;;  %154 = vmatpush.bf16.msra.mxu1 %v373_v9 }
  0x13   :  { %171 = vmatpush.bf16.msra.mxu2 %v373_v9  ;;  %194 = vmatpush.bf16.msra.mxu3 %v373_v9 }
  0x16   :  { %215 = vmatpush.bf16.msrb.mxu0 %v375_v3  ;;  %155 = vmatpush.bf16.msra.mxu1 %v372_v10 }
  0x17   :  { %172 = vmatpush.bf16.msra.mxu2 %v372_v10  ;;  %195 = vmatpush.bf16.msra.mxu3 %v372_v10 }
  0x1a   :  { %216 = vmatpush.bf16.msrb.mxu0 %v374_v7  ;;  %156 = vmatpush.bf16.msra.mxu1 %v371_v11 }
  0x1b   :  { %173 = vmatpush.bf16.msra.mxu2 %v371_v11  ;;  %196 = vmatpush.bf16.msra.mxu3 %v371_v11 }
  0x1e   :  { %217 = vmatpush.bf16.msrb.mxu0 %v373_v9  ;;  %157 = vmatpush.bf16.msra.mxu1 %v370_v12 }
  0x1f   :  { %174 = vmatpush.bf16.msra.mxu2 %v370_v12  ;;  %197 = vmatpush.bf16.msra.mxu3 %v370_v12 }
  0x22   :  { %218 = vmatpush.bf16.msrb.mxu0 %v372_v10  ;;  %158 = vmatpush.bf16.msra.mxu1 %v369_v13 }
  0x23   :  { %175 = vmatpush.bf16.msra.mxu2 %v369_v13  ;;  %198 = vmatpush.bf16.msra.mxu3 %v369_v13 }
  0x25   :  { %159 = vmatmul.bf16.vlgmr.msra.gmra.mxu1 %v102_v15 }
  0x26   :  { %219 = vmatpush.bf16.msrb.mxu0 %v371_v11  ;;  %237 = vmatpush.bf16.msrb.mxu1 %v376_v0 }
  0x27   :  { %254 = vmatpush.bf16.msrb.mxu2 %v376_v0  ;;  %277 = vmatpush.bf16.msrb.mxu3 %v376_v0 }
  0x2a   :  { %220 = vmatpush.bf16.msrb.mxu0 %v370_v12  ;;  %238 = vmatpush.bf16.msrb.mxu1 %v375_v3 }
  0x2b   :  { %255 = vmatpush.bf16.msrb.mxu2 %v375_v3  ;;  %278 = vmatpush.bf16.msrb.mxu3 %v375_v3 }
  0x2e   :  { %221 = vmatpush.bf16.msrb.mxu0 %v369_v13  ;;  %239 = vmatpush.bf16.msrb.mxu1 %v374_v7 }
  0x2f   :  { %256 = vmatpush.bf16.msrb.mxu2 %v374_v7  ;;  %279 = vmatpush.bf16.msrb.mxu3 %v374_v7 }
  0x32   :  { %300 = vmatpush.bf16.msra.mxu0 %v376_v0  ;;  %240 = vmatpush.bf16.msrb.mxu1 %v373_v9 }
  0x33   :  { %257 = vmatpush.bf16.msrb.mxu2 %v373_v9  ;;  %280 = vmatpush.bf16.msrb.mxu3 %v373_v9 }
  0x36   :  { %301 = vmatpush.bf16.msra.mxu0 %v375_v3  ;;  %241 = vmatpush.bf16.msrb.mxu1 %v372_v10 }
  0x37   :  { %258 = vmatpush.bf16.msrb.mxu2 %v372_v10  ;;  %281 = vmatpush.bf16.msrb.mxu3 %v372_v10 }
  0x3a   :  { %302 = vmatpush.bf16.msra.mxu0 %v374_v7  ;;  %242 = vmatpush.bf16.msrb.mxu1 %v371_v11 }
  0x3b   :  { %259 = vmatpush.bf16.msrb.mxu2 %v371_v11  ;;  %282 = vmatpush.bf16.msrb.mxu3 %v371_v11 }
  0x3e   :  { %303 = vmatpush.bf16.msra.mxu0 %v373_v9  ;;  %243 = vmatpush.bf16.msrb.mxu1 %v370_v12 }
  0x3f   :  { %260 = vmatpush.bf16.msrb.mxu2 %v370_v12  ;;  %283 = vmatpush.bf16.msrb.mxu3 %v370_v12 }
  0x42   :  { %304 = vmatpush.bf16.msra.mxu0 %v372_v10  ;;  %244 = vmatpush.bf16.msrb.mxu1 %v369_v13 }
  0x43   :  { %261 = vmatpush.bf16.msrb.mxu2 %v369_v13  ;;  %284 = vmatpush.bf16.msrb.mxu3 %v369_v13 }
  0x46   :  { %305 = vmatpush.bf16.msra.mxu0 %v371_v11 }
  0x4a   :  { %306 = vmatpush.bf16.msra.mxu0 %v370_v12 }
  0x4e   :  { %307 = vmatpush.bf16.msra.mxu0 %v369_v13 }
  0x8e   :  { %v96_v17 = vpop.f32.mrf.mxu0 }
  0x8f   :  { %v97_v18 = vadd.f32 %v383_v16, %v96_v17 }
  0x96   :  { %v98_v38 = vpop.f32.mrf.mxu0 }
  0x97   :  { %v99_v46 = vadd.f32 %v383_v16, %v98_v38 }
  0xa2   :  { %v160_v19 = vpop.f32.mrf.mxu1 }
  0xa3   :  { %v164_v20 = vadd.f32 %v160_v19, %v97_v18 }
  0xa5   :  { %384 = vtanh.f32 %v164_v20 }
  0xaa   :  { %v162_v21 = vpop.f32.mrf.mxu1 }
  0xab   :  { %v385_v22 = vpop.eup %384 }
  0xac   :  { %166 = vst [vmem:[%s509_s5] sm:$0x3] %v385_v22  ;;  %v167_v23 = vpack.c.bf16 %v385_v22, %v385_v22 }
  0xae   :  { %176 = vmatmul.bf16.vlgmr.msra.gmra.mxu2 %v167_v23 }
 0x131   :  { %v177_v24 = vpop.f32.mrf.mxu2 }
 0x132   :  { %v182_v25 = vrot.slane %v177_v24, 6 }
 0x134   :  { %v184_v26 = vadd.f32 %v182_v25, %v97_v18 }
 0x136   :  { %386 = vtanh.f32 %v184_v26 }
 0x139   :  { %v179_v27 = vpop.f32.mrf.mxu2 }
 0x13c   :  { %v387_v28 = vpop.eup %386 }
 0x13d   :  { %186 = vst [vmem:[%s509_s5] sm:$0xc] %v387_v28  ;;  %v187_v29 = vpack.c.bf16 %v387_v28, %v387_v28 }
 0x13f   :  { %v189_v30 = vrot.slane %v187_v29, 1 }
 0x141   :  { %199 = vmatmul.bf16.vlgmr.msra.gmra.mxu3 %v189_v30 }
 0x1c4   :  { %v200_v31 = vpop.f32.mrf.mxu3 }
 0x1c5   :  { %v205_v32 = vrot.slane %v200_v31, 4 }
 0x1c7   :  { %v207_v33 = vadd.f32 %v205_v32, %v97_v18 }
 0x1c9   :  { %388 = vtanh.f32 %v207_v33 }
 0x1cc   :  { %v202_v34 = vpop.f32.mrf.mxu3 }
 0x1cf   :  { %v389_v35 = vpop.eup %388 }
 0x1d0   :  { %209 = vst [vmem:[%s509_s5] sm:$0x30] %v389_v35  ;;  %v210_v36 = vpack.c.bf16 %v389_v35, %v389_v35 }
 0x1d2   :  { %v212_v37 = vrot.slane %v210_v36, 2 }
 0x1d4   :  { %222 = vmatmul.bf16.vlgmr.msrb.gmra.mxu0 %v212_v37 }
 0x251   :  { %v223_v39 = vpop.f32.mrf.mxu0 }
 0x252   :  { %v228_v40 = vrot.slane %v223_v39, 2 }
 0x254   :  { %v230_v41 = vadd.f32 %v228_v40, %v97_v18 }
 0x256   :  { %390 = vtanh.f32 %v230_v41 }
 0x259   :  { %v225_v42 = vpop.f32.mrf.mxu0 }
 0x25c   :  { %v391_v43 = vpop.eup %390 }
 0x25d   :  { %232 = vst [vmem:[%s509_s5] sm:$0xc0] %v391_v43  ;;  %v233_v44 = vpack.c.bf16 %v391_v43, %v391_v43 }
 0x25f   :  { %v235_v45 = vrot.slane %v233_v44, 3 }
 0x261   :  { %245 = vmatmul.bf16.vlgmr.msrb.gmra.mxu1 %v235_v45 }
 0x2de   :  { %v246_v47 = vpop.f32.mrf.mxu1 }
 0x2df   :  { %v250_v48 = vadd.f32 %v246_v47, %v99_v46 }
 0x2e1   :  { %392 = vtanh.f32 %v250_v48 }
 0x2e6   :  { %v248_v49 = vpop.f32.mrf.mxu1 }
 0x2e7   :  { %v393_v50 = vpop.eup %392 }
 0x2e8   :  { %252 = vst [vmem:[%s509_s5 + $0x8] sm:$0x3] %v393_v50  ;;  %v253_v51 = vpack.c.bf16 %v393_v50, %v393_v50 }
 0x2ea   :  { %262 = vmatmul.bf16.vlgmr.msrb.gmra.mxu2 %v253_v51 }
 0x36d   :  { %v263_v52 = vpop.f32.mrf.mxu2 }
 0x36e   :  { %v268_v53 = vrot.slane %v263_v52, 6 }
 0x370   :  { %v270_v54 = vadd.f32 %v268_v53, %v99_v46 }
 0x372   :  { %394 = vtanh.f32 %v270_v54 }
 0x375   :  { %v265_v55 = vpop.f32.mrf.mxu2 }
 0x378   :  { %v395_v56 = vpop.eup %394 }
 0x379   :  { %272 = vst [vmem:[%s509_s5 + $0x8] sm:$0xc] %v395_v56  ;;  %v273_v57 = vpack.c.bf16 %v395_v56, %v395_v56 }
 0x37b   :  { %v275_v58 = vrot.slane %v273_v57, 1 }
 0x37d   :  { %285 = vmatmul.bf16.vlgmr.msrb.gmra.mxu3 %v275_v58 }
 0x400   :  { %v286_v59 = vpop.f32.mrf.mxu3 }
 0x401   :  { %v291_v60 = vrot.slane %v286_v59, 4 }
 0x403   :  { %v293_v61 = vadd.f32 %v291_v60, %v99_v46 }
 0x405   :  { %396 = vtanh.f32 %v293_v61 }
 0x408   :  { %v288_v62 = vpop.f32.mrf.mxu3 }
 0x40b   :  { %v397_v63 = vpop.eup %396 }
 0x40c   :  { %295 = vst [vmem:[%s509_s5 + $0x8] sm:$0x30] %v397_v63  ;;  %v296_v0 = vpack.c.bf16 %v397_v63, %v397_v63 }
 0x40e   :  { %v298_v1 = vrot.slane %v296_v0, 2 }
 0x410   :  { %308 = vmatmul.bf16.vlgmr.msra.gmra.mxu0 %v298_v1 }
 0x48d   :  { %v309_v2 = vpop.f32.mrf.mxu0 }
 0x48e   :  { %v314_v3 = vrot.slane %v309_v2, 2 }
 0x490   :  { %v316_v4 = vadd.f32 %v314_v3, %v99_v46 }
 0x492   :  { %398 = vtanh.f32 %v316_v4 }
 0x495   :  { %v311_v5 = vpop.f32.mrf.mxu0 }
 0x498   :  { %v399_v6 = vpop.eup %398 }
 0x499   :  { %318 = vst [vmem:[%s509_s5 + $0x8] sm:$0xc0] %v399_v6 }
 0x49a   :  { %323 = vsyncpa [#allocation3], 1 }

</bundles_post_ra>
